<compile_context>
chip_gen: v6e
topology: v6e:2x2x1
jax: 0.10.0
libtpu: 0.0.40
codegen_flags: <defaults>
</compile_context>

<pallas_src>
import jax
import jax.numpy as jnp
import numpy as np
from jax import lax
from jax.experimental import pallas as pl
from jax.experimental.pallas import tpu as pltpu


def _round_up(v, m):
    return (v + m - 1) // m * m


def _pick_batch_block(B):
    # Fold batch into the matmul N (lane) axis, but keep >= 2 grid steps so both
    # TensorCores stay busy on v7x (v5e/v6e have 1 TC, so any fold is a win there).
    best = 1
    for d in range(2, B // 2 + 1):
        if B % d == 0:
            best = d
    return best


def _prep_stacked_weights(w, cpad, compute_dtype):
    """PyTorch ConvTranspose2d weight (Ci, Co, 3, 3), stride=1, pad=1 is a regular 3x3
    conv with the kernel spatially flipped and in/out channels swapped.  Stack the 9
    taps along the contraction axis: out[o, t*cpad + c] = flip(w)[c, o, a, b] with
    t = a*3 + b, zero-padded from Ci to cpad channels per tap."""
    ci, co, kh, kw = w.shape
    assert (kh, kw) == (3, 3)
    wf = jnp.flip(w, axis=(2, 3))                               # (ci, co, 3, 3)
    wt = jnp.transpose(wf, (2, 3, 1, 0)).reshape(9, co, ci)     # (9, co, ci)
    if cpad > ci:
        wt = jnp.pad(wt, ((0, 0), (0, 0), (0, cpad - ci)))
    ws = jnp.transpose(wt, (1, 0, 2)).reshape(co, 9 * cpad)     # (co, 9*cpad)
    return ws.astype(compute_dtype)


def unet_block2d(x, s, w1, w2, *, compute_dtype=jnp.bfloat16, batch_block=None):
    """x: [B, Cx, H, W], s: [B, Cs, H, W] (NCHW, like PyTorch).
       w1: [Cx+Cs, Cmid, 3, 3], w2: [Cmid, Cout, 3, 3] (ConvTranspose2d layout).
       Returns [B, Cout, H, W] float32.
       compute_dtype: dtype of the MXU operands (bf16 default -> bf16-native MXU,
       half the stacked-operand VMEM); accumulation, ReLU and masking stay f32.
       Use compute_dtype=jnp.float32 for exact PyTorch parity."""
    B, Cx, H, W = x.shape
    Bs, Cs, Hs, Ws = s.shape
    assert (Bs, Hs, Ws) == (B, H, W)
    Cin, Cmid, kH, kW = w1.shape
    Cmid2, Cout, kH2, kW2 = w2.shape
    assert Cin == Cx + Cs and Cmid2 == Cmid and (kH, kW, kH2, kW2) == (3, 3, 3, 3)
    assert H >= 2 and W >= 2

    HW = H * W
    bb = _pick_batch_block(B) if batch_block is None else batch_block
    assert B % bb == 0
    N = bb * HW                    # matmul N (lane) axis: bb images side by side

    G = 128                        # 128-aligned interior start -> unmasked stores
    HALO = W + 1                   # widest read overhang of any tap (|dh*W + dw|)
    assert HALO <= G
    NQ = G + _round_up(N + HALO, 128)

    Cpad1 = _round_up(Cin, 8)      # 12 -> 16: zero weight rows, aligned tap blocks
    Cpad2 = _round_up(Cmid, 8)
    K1 = 9 * Cpad1                 # stacked contraction depths
    K2 = 9 * Cpad2

    TAPS = tuple((a, b) for a in range(3) for b in range(3))

    def kernel(x_ref, s_ref, w1_ref, w2_ref, o_ref, q1_ref, q2_ref, st1_ref, st2_ref):
        f32 = jnp.float32

        # ---- (re)initialize only the regions the taps actually read --------------
        q1_ref[:, G - HALO:G] = jnp.zeros((Cpad1, HALO), f32)
        q1_ref[:, G + N:G + N + HALO] = jnp.zeros((Cpad1, HALO), f32)
        q2_ref[:, G - HALO:G] = jnp.zeros((Cpad2, HALO), f32)
        q2_ref[:, G + N:G + N + HALO] = jnp.zeros((Cpad2, HALO), f32)
        if Cpad1 > Cin:                                   # padded channels: keep zero
            q1_ref[Cin:Cpad1, G:G + N] = jnp.zeros((Cpad1 - Cin, N), f32)
        if Cpad2 > Cmid:
            q2_ref[Cmid:Cpad2, G:G + N] = jnp.zeros((Cpad2 - Cmid, N), f32)

        # ---- fused channel concat + batch fold: lane-aligned interior stores -----
        for k in range(bb):
            q1_ref[0:Cx, G + k * HW:G + (k + 1) * HW] = x_ref[k]
            q1_ref[Cx:Cin, G + k * HW:G + (k + 1) * HW] = s_ref[k]

        # ---- hoisted per-lane validity masks over the folded bb*H*W lane axis ----
        pos = lax.broadcasted_iota(jnp.int32, (1, N), 1)
        col = pos % W
        row = (pos // W) % H
        col_l = col >= 1           # reading column j-1 is invalid at j == 0
        col_r = col <= W - 2       # reading column j+1 is invalid at j == W-1
        row_t = row >= 1           # reading row i-1 is invalid at i == 0
        row_b = row <= H - 2       # reading row i+1 is invalid at i == H-1

        def tap_mask(a, b):
            ms = []
            if bb > 1:             # cross-image bleed only exists when batch is folded
                if a == 0:
                    ms.append(row_t)
                if a == 2:
                    ms.append(row_b)
            if b == 0:
                ms.append(col_l)
            if b == 2:
                ms.append(col_r)
            if not ms:
                return None
            m = ms[0]
            for mm in ms[1:]:
                m = jnp.logical_and(m, mm)
            return m

        masks = [tap_mask(a, b) for (a, b) in TAPS]

        def build_stack(q_ref, cpad, st_ref):
            # im2col into the stacked-K operand (9*cpad, N); masking in f32, cast at
            # the (sublane-aligned) store into the compute_dtype scratch.
            for t, (a, b) in enumerate(TAPS):
                d = (a - 1) * W + (b - 1)
                u = q_ref[:, G + d:G + d + N]              # (cpad, N) f32
                if masks[t] is not None:
                    u = jnp.where(masks[t], u, jnp.zeros_like(u))
                st_ref[t * cpad:(t + 1) * cpad, :] = u.astype(st_ref.dtype)

        # ---- conv1 (ConvT 3x3, pad 1): ONE stacked-K MXU dot + ReLU ---------------
        build_stack(q1_ref, Cpad1, st1_ref)
        h1 = jnp.dot(w1_ref[...], st1_ref[...], preferred_element_type=jnp.float32)
        h1 = jnp.maximum(h1, 0.0)                          # (Cmid, N) f32

        # ---- conv2: intermediate never leaves VMEM --------------------------------
        q2_ref[0:Cmid, G:G + N] = h1                       # lane-aligned unmasked store
        build_stack(q2_ref, Cpad2, st2_ref)
        h2 = jnp.dot(w2_ref[...], st2_ref[...], preferred_element_type=jnp.float32)
        h2 = jnp.maximum(h2, 0.0)                          # (Cout, N) f32

        for k in range(bb):
            o_ref[k] = h2[:, k * HW:(k + 1) * HW].astype(o_ref.dtype)

    # MXU operands in compute_dtype; inputs/outputs stay f32 (exact concat bits).
    w1s = _prep_stacked_weights(w1, Cpad1, compute_dtype)      # (Cmid, K1)
    w2s = _prep_stacked_weights(w2, Cpad2, compute_dtype)      # (Cout, K2)

    # Free reshapes only (contiguous dim merge) -- no HBM transpose.
    x2 = x.reshape(B, Cx, HW).astype(jnp.float32)
    s2 = s.reshape(B, Cs, HW).astype(jnp.float32)

    flops = 2 * B * HW * 9 * (Cin * Cmid + Cmid * Cout)
    bytes_accessed = ((x2.size + s2.size) * 4
                      + (w1s.size + w2s.size) * w1s.dtype.itemsize
                      + B * Cout * HW * 4)

    out = pl.pallas_call(
        kernel,
        out_shape=jax.ShapeDtypeStruct((B, Cout, HW), jnp.float32),
        grid=(B // bb,),
        in_specs=[
            pl.BlockSpec((bb, Cx, HW), lambda g: (g, 0, 0)),     # x   (bb images/step)
            pl.BlockSpec((bb, Cs, HW), lambda g: (g, 0, 0)),     # s
            pl.BlockSpec((Cmid, K1), lambda g: (0, 0)),          # conv1 stacked weights
            pl.BlockSpec((Cout, K2), lambda g: (0, 0)),          # conv2 stacked weights
        ],
        out_specs=pl.BlockSpec((bb, Cout, HW), lambda g: (g, 0, 0)),
        scratch_shapes=[
            pltpu.VMEM((Cpad1, NQ), jnp.float32),   # haloed concat(x, s)      (f32)
            pltpu.VMEM((Cpad2, NQ), jnp.float32),   # haloed relu(conv1)       (f32)
            pltpu.VMEM((K1, N), compute_dtype),     # stacked-K operand, conv1
            pltpu.VMEM((K2, N), compute_dtype),     # stacked-K operand, conv2
        ],
        compiler_params=pltpu.CompilerParams(
            dimension_semantics=("parallel",)),
        cost_estimate=pl.CostEstimate(flops=flops, transcendentals=0,
                                      bytes_accessed=bytes_accessed),
    )(x2, s2, w1s, w2s)

    return out.reshape(B, Cout, H, W)


# ----------------------------- pure-JAX reference ---------------------------------
def _conv_transpose2d_ref(x, w, padding):
    """Literal scatter-form ConvTranspose2d (stride=1), PyTorch weight layout."""
    B, Ci, H, W = x.shape
    _, Co, kH, kW = w.shape
    yf = jnp.zeros((B, Co, H + kH - 1, W + kW - 1), jnp.float32)
    for a in range(kH):
        for b in range(kW):
            yf = yf.at[:, :, a:a + H, b:b + W].add(
                jnp.einsum('bchw,co->bohw', x, w[:, :, a, b],
                           precision=jax.lax.Precision.HIGHEST))
    Ho = H + kH - 1 - 2 * padding
    Wo = W + kW - 1 - 2 * padding
    return yf[:, :, padding:padding + Ho, padding:padding + Wo]


def unet_block2d_ref(x, s, w1, w2):
    xs = jnp.concatenate([x, s], axis=1)
    h = jax.nn.relu(_conv_transpose2d_ref(xs, w1, 1))
    return jax.nn.relu(_conv_transpose2d_ref(h, w2, 1))


if __name__ == "__main__":
    # in_channels=8, skip_channels=4, out_channels=8, in_size=(16,16), k=3, stride=1
    B, Cx, Cs, Cmid, Cout, H, W = 2, 8, 4, 8, 8, 16, 16

    key = jax.random.PRNGKey(0)
    kx, ks, k1, k2 = jax.random.split(key, 4)
    x = jax.random.normal(kx, (B, Cx, H, W), dtype=jnp.float32)
    s = jax.random.normal(ks, (B, Cs, H, W), dtype=jnp.float32)
    w1 = jax.random.normal(k1, (Cx + Cs, Cmid, 3, 3), dtype=jnp.float32) * 0.1
    w2 = jax.random.normal(k2, (Cmid, Cout, 3, 3), dtype=jnp.float32) * 0.1

    ref = unet_block2d_ref(x, s, w1, w2)

    # Default fast path: bf16 MXU operands, f32 accumulation (relaxed tolerance).
    out = jax.block_until_ready(unet_block2d(x, s, w1, w2))
    np.testing.assert_allclose(np.asarray(out), np.asarray(ref), rtol=5e-2, atol=5e-2)

    # f32 operands: exact-parity path.
    out32 = jax.block_until_ready(unet_block2d(x, s, w1, w2,
                                               compute_dtype=jnp.float32))
    np.testing.assert_allclose(np.asarray(out32), np.asarray(ref), rtol=1e-3, atol=1e-3)

    # Batch-folding path: 2 images per grid step folded onto the matmul lane axis.
    B2 = 4
    kx2, ks2 = jax.random.split(jax.random.PRNGKey(1), 2)
    x4 = jax.random.normal(kx2, (B2, Cx, H, W), dtype=jnp.float32)
    s4 = jax.random.normal(ks2, (B2, Cs, H, W), dtype=jnp.float32)
    ref4 = unet_block2d_ref(x4, s4, w1, w2)
    out4 = jax.block_until_ready(unet_block2d(x4, s4, w1, w2))   # auto batch_block=2
    np.testing.assert_allclose(np.asarray(out4), np.asarray(ref4), rtol=5e-2, atol=5e-2)

    print("KERNEL_OK")
</pallas_src>

<mosaic_0001>
module attributes {stable_mosaic.version = 11 : i64} {
  func.func @kernel(%arg0: i32, %arg1: memref<1x8x256xf32, #tpu.memory_space<vmem>>, %arg2: memref<1x4x256xf32, #tpu.memory_space<vmem>>, %arg3: memref<8x144xbf16, #tpu.memory_space<vmem>>, %arg4: memref<8x72xbf16, #tpu.memory_space<vmem>>, %arg5: memref<1x8x256xf32, #tpu.memory_space<vmem>>, %arg6: memref<16x512xf32, #tpu.memory_space<vmem>>, %arg7: memref<8x512xf32, #tpu.memory_space<vmem>>, %arg8: memref<144x256xbf16, #tpu.memory_space<vmem>>, %arg9: memref<72x256xbf16, #tpu.memory_space<vmem>>) attributes {dimension_semantics = [#tpu.dimension_semantics<parallel>], iteration_bounds = array<i64: 2>, scalar_prefetch = 0 : i64, scratch_operands = 4 : i64, tpu.core_type = #tpu.core_type<tc>, window_params = [{transform_indices = @transform_0, window_bounds = array<i64: 1, 8, 256>}, {transform_indices = @transform_1, window_bounds = array<i64: 1, 4, 256>}, {pipeline_mode = #tpu.pipeline_mode<synchronous>, transform_indices = @transform_2, window_bounds = array<i64: 8, 144>}, {pipeline_mode = #tpu.pipeline_mode<synchronous>, transform_indices = @transform_3, window_bounds = array<i64: 8, 72>}, {transform_indices = @transform_4, window_bounds = array<i64: 1, 8, 256>}]} {
    %cst = arith.constant 0.000000e+00 : f32
    %0 = vector.broadcast %cst : f32 to vector<16x17xf32>
    %c0 = arith.constant 0 : index
    %c111 = arith.constant 111 : index
    %1 = vector.load %arg6[%c0, %c111] : memref<16x512xf32, #tpu.memory_space<vmem>>, vector<16x17xf32>
    tpu.vector_store %arg6[%c0, %c111], %0 {strides = array<i32>} : memref<16x512xf32, #tpu.memory_space<vmem>>, vector<16x17xf32>,
    %cst_0 = arith.constant 0.000000e+00 : f32
    %2 = vector.broadcast %cst_0 : f32 to vector<16x17xf32>
    %c0_1 = arith.constant 0 : index
    %c384 = arith.constant 384 : index
    %3 = vector.load %arg6[%c0_1, %c384] : memref<16x512xf32, #tpu.memory_space<vmem>>, vector<16x17xf32>
    tpu.vector_store %arg6[%c0_1, %c384], %2 {strides = array<i32>} : memref<16x512xf32, #tpu.memory_space<vmem>>, vector<16x17xf32>,
    %cst_2 = arith.constant 0.000000e+00 : f32
    %4 = vector.broadcast %cst_2 : f32 to vector<8x17xf32>
    %c0_3 = arith.constant 0 : index
    %c111_4 = arith.constant 111 : index
    %5 = vector.load %arg7[%c0_3, %c111_4] : memref<8x512xf32, #tpu.memory_space<vmem>>, vector<8x17xf32>
    tpu.vector_store %arg7[%c0_3, %c111_4], %4 {strides = array<i32>} : memref<8x512xf32, #tpu.memory_space<vmem>>, vector<8x17xf32>,
    %cst_5 = arith.constant 0.000000e+00 : f32
    %6 = vector.broadcast %cst_5 : f32 to vector<8x17xf32>
    %c0_6 = arith.constant 0 : index
    %c384_7 = arith.constant 384 : index
    %7 = vector.load %arg7[%c0_6, %c384_7] : memref<8x512xf32, #tpu.memory_space<vmem>>, vector<8x17xf32>
    tpu.vector_store %arg7[%c0_6, %c384_7], %6 {strides = array<i32>} : memref<8x512xf32, #tpu.memory_space<vmem>>, vector<8x17xf32>,
    %cst_8 = arith.constant 0.000000e+00 : f32
    %8 = vector.broadcast %cst_8 : f32 to vector<4x256xf32>
    %c12 = arith.constant 12 : index
    %c128 = arith.constant 128 : index
    %9 = vector.load %arg6[%c12, %c128] : memref<16x512xf32, #tpu.memory_space<vmem>>, vector<4x256xf32>
    tpu.vector_store %arg6[%c12, %c128], %8 {strides = array<i32>} : memref<16x512xf32, #tpu.memory_space<vmem>>, vector<4x256xf32>,
    %c0_9 = arith.constant 0 : index
    %c0_10 = arith.constant 0 : index
    %c0_11 = arith.constant 0 : index
    %10 = vector.load %arg1[%c0_9, %c0_10, %c0_11] : memref<1x8x256xf32, #tpu.memory_space<vmem>>, vector<1x8x256xf32>
    %11 = vector.shape_cast %10 : vector<1x8x256xf32> to vector<8x256xf32>
    %c0_12 = arith.constant 0 : index
    %c128_13 = arith.constant 128 : index
    %12 = vector.load %arg6[%c0_12, %c128_13] : memref<16x512xf32, #tpu.memory_space<vmem>>, vector<8x256xf32>
    tpu.vector_store %arg6[%c0_12, %c128_13], %11 {strides = array<i32>} : memref<16x512xf32, #tpu.memory_space<vmem>>, vector<8x256xf32>,
    %c0_14 = arith.constant 0 : index
    %c0_15 = arith.constant 0 : index
    %c0_16 = arith.constant 0 : index
    %13 = vector.load %arg2[%c0_14, %c0_15, %c0_16] : memref<1x4x256xf32, #tpu.memory_space<vmem>>, vector<1x4x256xf32>
    %14 = vector.shape_cast %13 : vector<1x4x256xf32> to vector<4x256xf32>
    %c8 = arith.constant 8 : index
    %c128_17 = arith.constant 128 : index
    %15 = vector.load %arg6[%c8, %c128_17] : memref<16x512xf32, #tpu.memory_space<vmem>>, vector<4x256xf32>
    tpu.vector_store %arg6[%c8, %c128_17], %14 {strides = array<i32>} : memref<16x512xf32, #tpu.memory_space<vmem>>, vector<4x256xf32>,
    %16 = tpu.iota {dimensions = array<i32: 1>} : vector<1x256xi32>
    %c16_i32 = arith.constant 16 : i32
    %c0_i32 = arith.constant 0 : i32
    %17 = arith.cmpi eq, %c16_i32, %c0_i32 : i32
    %c1_i32 = arith.constant 1 : i32
    %18 = arith.select %17, %c1_i32, %c16_i32 : i32
    %19 = vector.broadcast %18 : i32 to vector<1x256xi32>
    %20 = arith.remsi %16, %19 : vector<1x256xi32>
    %c0_i32_18 = arith.constant 0 : i32
    %21 = vector.broadcast %c0_i32_18 : i32 to vector<1x256xi32>
    %22 = arith.cmpi ne, %20, %21 : vector<1x256xi32>
    %c0_i32_19 = arith.constant 0 : i32
    %23 = vector.broadcast %c0_i32_19 : i32 to vector<1x256xi32>
    %24 = arith.cmpi slt, %20, %23 : vector<1x256xi32>
    %c0_i32_20 = arith.constant 0 : i32
    %25 = arith.cmpi slt, %18, %c0_i32_20 : i32
    %26 = vector.broadcast %25 : i1 to vector<1x256xi1>
    %27 = vector.broadcast %26 : vector<1x256xi1> to vector<1x256xi1>
    %28 = arith.xori %24, %27 : vector<1x256xi1>
    %29 = arith.andi %28, %22 : vector<1x256xi1>
    %30 = vector.broadcast %18 : i32 to vector<1x256xi32>
    %31 = arith.addi %20, %30 : vector<1x256xi32>
    %32 = arith.select %29, %31, %20 : vector<1x256xi1>, vector<1x256xi32>
    %c1_i32_21 = arith.constant 1 : i32
    %33 = vector.broadcast %c1_i32_21 : i32 to vector<1x256xi32>
    %34 = arith.cmpi sge, %32, %33 : vector<1x256xi32>
    %c14_i32 = arith.constant 14 : i32
    %35 = vector.broadcast %c14_i32 : i32 to vector<1x256xi32>
    %36 = arith.cmpi sle, %32, %35 : vector<1x256xi32>
    %c0_22 = arith.constant 0 : index
    %c111_23 = arith.constant 111 : index
    %37 = vector.load %arg6[%c0_22, %c111_23] : memref<16x512xf32, #tpu.memory_space<vmem>>, vector<16x256xf32>
    %cst_24 = arith.constant 0.000000e+00 : f32
    %38 = vector.broadcast %cst_24 : f32 to vector<16x256xf32>
    %39 = vector.shape_cast %34 : vector<1x256xi1> to vector<1x256xi1>
    %40 = vector.broadcast %39 : vector<1x256xi1> to vector<16x256xi1>
    %41 = arith.select %40, %37, %38 : vector<16x256xi1>, vector<16x256xf32>
    %42 = arith.truncf %41 : vector<16x256xf32> to vector<16x256xbf16>
    %c0_25 = arith.constant 0 : index
    %c0_26 = arith.constant 0 : index
    %43 = vector.load %arg8[%c0_25, %c0_26] : memref<144x256xbf16, #tpu.memory_space<vmem>>, vector<16x256xbf16>
    tpu.vector_store %arg8[%c0_25, %c0_26], %42 {strides = array<i32>} : memref<144x256xbf16, #tpu.memory_space<vmem>>, vector<16x256xbf16>,
    %c0_27 = arith.constant 0 : index
    %c112 = arith.constant 112 : index
    %44 = vector.load %arg6[%c0_27, %c112] : memref<16x512xf32, #tpu.memory_space<vmem>>, vector<16x256xf32>
    %45 = arith.truncf %44 : vector<16x256xf32> to vector<16x256xbf16>
    %c16 = arith.constant 16 : index
    %c0_28 = arith.constant 0 : index
    %46 = vector.load %arg8[%c16, %c0_28] : memref<144x256xbf16, #tpu.memory_space<vmem>>, vector<16x256xbf16>
    tpu.vector_store %arg8[%c16, %c0_28], %45 {strides = array<i32>} : memref<144x256xbf16, #tpu.memory_space<vmem>>, vector<16x256xbf16>,
    %c0_29 = arith.constant 0 : index
    %c113 = arith.constant 113 : index
    %47 = vector.load %arg6[%c0_29, %c113] : memref<16x512xf32, #tpu.memory_space<vmem>>, vector<16x256xf32>
    %cst_30 = arith.constant 0.000000e+00 : f32
    %48 = vector.broadcast %cst_30 : f32 to vector<16x256xf32>
    %49 = vector.shape_cast %36 : vector<1x256xi1> to vector<1x256xi1>
    %50 = vector.broadcast %49 : vector<1x256xi1> to vector<16x256xi1>
    %51 = arith.select %50, %47, %48 : vector<16x256xi1>, vector<16x256xf32>
    %52 = arith.truncf %51 : vector<16x256xf32> to vector<16x256xbf16>
    %c32 = arith.constant 32 : index
    %c0_31 = arith.constant 0 : index
    %53 = vector.load %arg8[%c32, %c0_31] : memref<144x256xbf16, #tpu.memory_space<vmem>>, vector<16x256xbf16>
    tpu.vector_store %arg8[%c32, %c0_31], %52 {strides = array<i32>} : memref<144x256xbf16, #tpu.memory_space<vmem>>, vector<16x256xbf16>,
    %c0_32 = arith.constant 0 : index
    %c127 = arith.constant 127 : index
    %54 = vector.load %arg6[%c0_32, %c127] : memref<16x512xf32, #tpu.memory_space<vmem>>, vector<16x256xf32>
    %cst_33 = arith.constant 0.000000e+00 : f32
    %55 = vector.broadcast %cst_33 : f32 to vector<16x256xf32>
    %56 = vector.shape_cast %34 : vector<1x256xi1> to vector<1x256xi1>
    %57 = vector.broadcast %56 : vector<1x256xi1> to vector<16x256xi1>
    %58 = arith.select %57, %54, %55 : vector<16x256xi1>, vector<16x256xf32>
    %59 = arith.truncf %58 : vector<16x256xf32> to vector<16x256xbf16>
    %c48 = arith.constant 48 : index
    %c0_34 = arith.constant 0 : index
    %60 = vector.load %arg8[%c48, %c0_34] : memref<144x256xbf16, #tpu.memory_space<vmem>>, vector<16x256xbf16>
    tpu.vector_store %arg8[%c48, %c0_34], %59 {strides = array<i32>} : memref<144x256xbf16, #tpu.memory_space<vmem>>, vector<16x256xbf16>,
    %c0_35 = arith.constant 0 : index
    %c128_36 = arith.constant 128 : index
    %61 = vector.load %arg6[%c0_35, %c128_36] : memref<16x512xf32, #tpu.memory_space<vmem>>, vector<16x256xf32>
    %62 = arith.truncf %61 : vector<16x256xf32> to vector<16x256xbf16>
    %c64 = arith.constant 64 : index
    %c0_37 = arith.constant 0 : index
    %63 = vector.load %arg8[%c64, %c0_37] : memref<144x256xbf16, #tpu.memory_space<vmem>>, vector<16x256xbf16>
    tpu.vector_store %arg8[%c64, %c0_37], %62 {strides = array<i32>} : memref<144x256xbf16, #tpu.memory_space<vmem>>, vector<16x256xbf16>,
    %c0_38 = arith.constant 0 : index
    %c129 = arith.constant 129 : index
    %64 = vector.load %arg6[%c0_38, %c129] : memref<16x512xf32, #tpu.memory_space<vmem>>, vector<16x256xf32>
    %cst_39 = arith.constant 0.000000e+00 : f32
    %65 = vector.broadcast %cst_39 : f32 to vector<16x256xf32>
    %66 = vector.shape_cast %36 : vector<1x256xi1> to vector<1x256xi1>
    %67 = vector.broadcast %66 : vector<1x256xi1> to vector<16x256xi1>
    %68 = arith.select %67, %64, %65 : vector<16x256xi1>, vector<16x256xf32>
    %69 = arith.truncf %68 : vector<16x256xf32> to vector<16x256xbf16>
    %c80 = arith.constant 80 : index
    %c0_40 = arith.constant 0 : index
    %70 = vector.load %arg8[%c80, %c0_40] : memref<144x256xbf16, #tpu.memory_space<vmem>>, vector<16x256xbf16>
    tpu.vector_store %arg8[%c80, %c0_40], %69 {strides = array<i32>} : memref<144x256xbf16, #tpu.memory_space<vmem>>, vector<16x256xbf16>,
    %c0_41 = arith.constant 0 : index
    %c143 = arith.constant 143 : index
    %71 = vector.load %arg6[%c0_41, %c143] : memref<16x512xf32, #tpu.memory_space<vmem>>, vector<16x256xf32>
    %cst_42 = arith.constant 0.000000e+00 : f32
    %72 = vector.broadcast %cst_42 : f32 to vector<16x256xf32>
    %73 = vector.shape_cast %34 : vector<1x256xi1> to vector<1x256xi1>
    %74 = vector.broadcast %73 : vector<1x256xi1> to vector<16x256xi1>
    %75 = arith.select %74, %71, %72 : vector<16x256xi1>, vector<16x256xf32>
    %76 = arith.truncf %75 : vector<16x256xf32> to vector<16x256xbf16>
    %c96 = arith.constant 96 : index
    %c0_43 = arith.constant 0 : index
    %77 = vector.load %arg8[%c96, %c0_43] : memref<144x256xbf16, #tpu.memory_space<vmem>>, vector<16x256xbf16>
    tpu.vector_store %arg8[%c96, %c0_43], %76 {strides = array<i32>} : memref<144x256xbf16, #tpu.memory_space<vmem>>, vector<16x256xbf16>,
    %c0_44 = arith.constant 0 : index
    %c144 = arith.constant 144 : index
    %78 = vector.load %arg6[%c0_44, %c144] : memref<16x512xf32, #tpu.memory_space<vmem>>, vector<16x256xf32>
    %79 = arith.truncf %78 : vector<16x256xf32> to vector<16x256xbf16>
    %c112_45 = arith.constant 112 : index
    %c0_46 = arith.constant 0 : index
    %80 = vector.load %arg8[%c112_45, %c0_46] : memref<144x256xbf16, #tpu.memory_space<vmem>>, vector<16x256xbf16>
    tpu.vector_store %arg8[%c112_45, %c0_46], %79 {strides = array<i32>} : memref<144x256xbf16, #tpu.memory_space<vmem>>, vector<16x256xbf16>,
    %c0_47 = arith.constant 0 : index
    %c145 = arith.constant 145 : index
    %81 = vector.load %arg6[%c0_47, %c145] : memref<16x512xf32, #tpu.memory_space<vmem>>, vector<16x256xf32>
    %cst_48 = arith.constant 0.000000e+00 : f32
    %82 = vector.broadcast %cst_48 : f32 to vector<16x256xf32>
    %83 = vector.shape_cast %36 : vector<1x256xi1> to vector<1x256xi1>
    %84 = vector.broadcast %83 : vector<1x256xi1> to vector<16x256xi1>
    %85 = arith.select %84, %81, %82 : vector<16x256xi1>, vector<16x256xf32>
    %86 = arith.truncf %85 : vector<16x256xf32> to vector<16x256xbf16>
    %c128_49 = arith.constant 128 : index
    %c0_50 = arith.constant 0 : index
    %87 = vector.load %arg8[%c128_49, %c0_50] : memref<144x256xbf16, #tpu.memory_space<vmem>>, vector<16x256xbf16>
    tpu.vector_store %arg8[%c128_49, %c0_50], %86 {strides = array<i32>} : memref<144x256xbf16, #tpu.memory_space<vmem>>, vector<16x256xbf16>,
    %c0_51 = arith.constant 0 : index
    %c0_52 = arith.constant 0 : index
    %88 = vector.load %arg3[%c0_51, %c0_52] : memref<8x144xbf16, #tpu.memory_space<vmem>>, vector<8x144xbf16>
    %c0_53 = arith.constant 0 : index
    %c0_54 = arith.constant 0 : index
    %89 = vector.load %arg8[%c0_53, %c0_54] : memref<144x256xbf16, #tpu.memory_space<vmem>>, vector<144x256xbf16>
    %cst_55 = arith.constant dense<0.000000e+00> : vector<8x256xf32>
    %90 = tpu.matmul %88, %89, %cst_55 {dimension_numbers = #tpu.dot_dimension_numbers<[1], [0], [0], [1], [0, 0, 1, 1], [], []>} : vector<8x144xbf16>, vector<144x256xbf16>, vector<8x256xf32> -> vector<8x256xf32>
    %cst_56 = arith.constant 0.000000e+00 : f32
    %91 = vector.broadcast %cst_56 : f32 to vector<8x256xf32>
    %92 = arith.maximumf %90, %91 : vector<8x256xf32>
    %c0_57 = arith.constant 0 : index
    %c128_58 = arith.constant 128 : index
    %93 = vector.load %arg7[%c0_57, %c128_58] : memref<8x512xf32, #tpu.memory_space<vmem>>, vector<8x256xf32>
    tpu.vector_store %arg7[%c0_57, %c128_58], %92 {strides = array<i32>} : memref<8x512xf32, #tpu.memory_space<vmem>>, vector<8x256xf32>,
    %c0_59 = arith.constant 0 : index
    %c111_60 = arith.constant 111 : index
    %94 = vector.load %arg7[%c0_59, %c111_60] : memref<8x512xf32, #tpu.memory_space<vmem>>, vector<8x256xf32>
    %cst_61 = arith.constant 0.000000e+00 : f32
    %95 = vector.broadcast %cst_61 : f32 to vector<8x256xf32>
    %96 = vector.shape_cast %34 : vector<1x256xi1> to vector<1x256xi1>
    %97 = vector.broadcast %96 : vector<1x256xi1> to vector<8x256xi1>
    %98 = arith.select %97, %94, %95 : vector<8x256xi1>, vector<8x256xf32>
    %99 = arith.truncf %98 : vector<8x256xf32> to vector<8x256xbf16>
    %c0_62 = arith.constant 0 : index
    %c0_63 = arith.constant 0 : index
    %100 = vector.load %arg9[%c0_62, %c0_63] : memref<72x256xbf16, #tpu.memory_space<vmem>>, vector<8x256xbf16>
    tpu.vector_store %arg9[%c0_62, %c0_63], %99 {strides = array<i32>} : memref<72x256xbf16, #tpu.memory_space<vmem>>, vector<8x256xbf16>,
    %c0_64 = arith.constant 0 : index
    %c112_65 = arith.constant 112 : index
    %101 = vector.load %arg7[%c0_64, %c112_65] : memref<8x512xf32, #tpu.memory_space<vmem>>, vector<8x256xf32>
    %102 = arith.truncf %101 : vector<8x256xf32> to vector<8x256xbf16>
    %c8_66 = arith.constant 8 : index
    %c0_67 = arith.constant 0 : index
    %103 = vector.load %arg9[%c8_66, %c0_67] : memref<72x256xbf16, #tpu.memory_space<vmem>>, vector<8x256xbf16>
    tpu.vector_store %arg9[%c8_66, %c0_67], %102 {strides = array<i32>} : memref<72x256xbf16, #tpu.memory_space<vmem>>, vector<8x256xbf16>,
    %c0_68 = arith.constant 0 : index
    %c113_69 = arith.constant 113 : index
    %104 = vector.load %arg7[%c0_68, %c113_69] : memref<8x512xf32, #tpu.memory_space<vmem>>, vector<8x256xf32>
    %cst_70 = arith.constant 0.000000e+00 : f32
    %105 = vector.broadcast %cst_70 : f32 to vector<8x256xf32>
    %106 = vector.shape_cast %36 : vector<1x256xi1> to vector<1x256xi1>
    %107 = vector.broadcast %106 : vector<1x256xi1> to vector<8x256xi1>
    %108 = arith.select %107, %104, %105 : vector<8x256xi1>, vector<8x256xf32>
    %109 = arith.truncf %108 : vector<8x256xf32> to vector<8x256xbf16>
    %c16_71 = arith.constant 16 : index
    %c0_72 = arith.constant 0 : index
    %110 = vector.load %arg9[%c16_71, %c0_72] : memref<72x256xbf16, #tpu.memory_space<vmem>>, vector<8x256xbf16>
    tpu.vector_store %arg9[%c16_71, %c0_72], %109 {strides = array<i32>} : memref<72x256xbf16, #tpu.memory_space<vmem>>, vector<8x256xbf16>,
    %c0_73 = arith.constant 0 : index
    %c127_74 = arith.constant 127 : index
    %111 = vector.load %arg7[%c0_73, %c127_74] : memref<8x512xf32, #tpu.memory_space<vmem>>, vector<8x256xf32>
    %cst_75 = arith.constant 0.000000e+00 : f32
    %112 = vector.broadcast %cst_75 : f32 to vector<8x256xf32>
    %113 = vector.shape_cast %34 : vector<1x256xi1> to vector<1x256xi1>
    %114 = vector.broadcast %113 : vector<1x256xi1> to vector<8x256xi1>
    %115 = arith.select %114, %111, %112 : vector<8x256xi1>, vector<8x256xf32>
    %116 = arith.truncf %115 : vector<8x256xf32> to vector<8x256xbf16>
    %c24 = arith.constant 24 : index
    %c0_76 = arith.constant 0 : index
    %117 = vector.load %arg9[%c24, %c0_76] : memref<72x256xbf16, #tpu.memory_space<vmem>>, vector<8x256xbf16>
    tpu.vector_store %arg9[%c24, %c0_76], %116 {strides = array<i32>} : memref<72x256xbf16, #tpu.memory_space<vmem>>, vector<8x256xbf16>,
    %c0_77 = arith.constant 0 : index
    %c128_78 = arith.constant 128 : index
    %118 = vector.load %arg7[%c0_77, %c128_78] : memref<8x512xf32, #tpu.memory_space<vmem>>, vector<8x256xf32>
    %119 = arith.truncf %118 : vector<8x256xf32> to vector<8x256xbf16>
    %c32_79 = arith.constant 32 : index
    %c0_80 = arith.constant 0 : index
    %120 = vector.load %arg9[%c32_79, %c0_80] : memref<72x256xbf16, #tpu.memory_space<vmem>>, vector<8x256xbf16>
    tpu.vector_store %arg9[%c32_79, %c0_80], %119 {strides = array<i32>} : memref<72x256xbf16, #tpu.memory_space<vmem>>, vector<8x256xbf16>,
    %c0_81 = arith.constant 0 : index
    %c129_82 = arith.constant 129 : index
    %121 = vector.load %arg7[%c0_81, %c129_82] : memref<8x512xf32, #tpu.memory_space<vmem>>, vector<8x256xf32>
    %cst_83 = arith.constant 0.000000e+00 : f32
    %122 = vector.broadcast %cst_83 : f32 to vector<8x256xf32>
    %123 = vector.shape_cast %36 : vector<1x256xi1> to vector<1x256xi1>
    %124 = vector.broadcast %123 : vector<1x256xi1> to vector<8x256xi1>
    %125 = arith.select %124, %121, %122 : vector<8x256xi1>, vector<8x256xf32>
    %126 = arith.truncf %125 : vector<8x256xf32> to vector<8x256xbf16>
    %c40 = arith.constant 40 : index
    %c0_84 = arith.constant 0 : index
    %127 = vector.load %arg9[%c40, %c0_84] : memref<72x256xbf16, #tpu.memory_space<vmem>>, vector<8x256xbf16>
    tpu.vector_store %arg9[%c40, %c0_84], %126 {strides = array<i32>} : memref<72x256xbf16, #tpu.memory_space<vmem>>, vector<8x256xbf16>,
    %c0_85 = arith.constant 0 : index
    %c143_86 = arith.constant 143 : index
    %128 = vector.load %arg7[%c0_85, %c143_86] : memref<8x512xf32, #tpu.memory_space<vmem>>, vector<8x256xf32>
    %cst_87 = arith.constant 0.000000e+00 : f32
    %129 = vector.broadcast %cst_87 : f32 to vector<8x256xf32>
    %130 = vector.shape_cast %34 : vector<1x256xi1> to vector<1x256xi1>
    %131 = vector.broadcast %130 : vector<1x256xi1> to vector<8x256xi1>
    %132 = arith.select %131, %128, %129 : vector<8x256xi1>, vector<8x256xf32>
    %133 = arith.truncf %132 : vector<8x256xf32> to vector<8x256xbf16>
    %c48_88 = arith.constant 48 : index
    %c0_89 = arith.constant 0 : index
    %134 = vector.load %arg9[%c48_88, %c0_89] : memref<72x256xbf16, #tpu.memory_space<vmem>>, vector<8x256xbf16>
    tpu.vector_store %arg9[%c48_88, %c0_89], %133 {strides = array<i32>} : memref<72x256xbf16, #tpu.memory_space<vmem>>, vector<8x256xbf16>,
    %c0_90 = arith.constant 0 : index
    %c144_91 = arith.constant 144 : index
    %135 = vector.load %arg7[%c0_90, %c144_91] : memref<8x512xf32, #tpu.memory_space<vmem>>, vector<8x256xf32>
    %136 = arith.truncf %135 : vector<8x256xf32> to vector<8x256xbf16>
    %c56 = arith.constant 56 : index
    %c0_92 = arith.constant 0 : index
    %137 = vector.load %arg9[%c56, %c0_92] : memref<72x256xbf16, #tpu.memory_space<vmem>>, vector<8x256xbf16>
    tpu.vector_store %arg9[%c56, %c0_92], %136 {strides = array<i32>} : memref<72x256xbf16, #tpu.memory_space<vmem>>, vector<8x256xbf16>,
    %c0_93 = arith.constant 0 : index
    %c145_94 = arith.constant 145 : index
    %138 = vector.load %arg7[%c0_93, %c145_94] : memref<8x512xf32, #tpu.memory_space<vmem>>, vector<8x256xf32>
    %cst_95 = arith.constant 0.000000e+00 : f32
    %139 = vector.broadcast %cst_95 : f32 to vector<8x256xf32>
    %140 = vector.shape_cast %36 : vector<1x256xi1> to vector<1x256xi1>
    %141 = vector.broadcast %140 : vector<1x256xi1> to vector<8x256xi1>
    %142 = arith.select %141, %138, %139 : vector<8x256xi1>, vector<8x256xf32>
    %143 = arith.truncf %142 : vector<8x256xf32> to vector<8x256xbf16>
    %c64_96 = arith.constant 64 : index
    %c0_97 = arith.constant 0 : index
    %144 = vector.load %arg9[%c64_96, %c0_97] : memref<72x256xbf16, #tpu.memory_space<vmem>>, vector<8x256xbf16>
    tpu.vector_store %arg9[%c64_96, %c0_97], %143 {strides = array<i32>} : memref<72x256xbf16, #tpu.memory_space<vmem>>, vector<8x256xbf16>,
    %c0_98 = arith.constant 0 : index
    %c0_99 = arith.constant 0 : index
    %145 = vector.load %arg4[%c0_98, %c0_99] : memref<8x72xbf16, #tpu.memory_space<vmem>>, vector<8x72xbf16>
    %c0_100 = arith.constant 0 : index
    %c0_101 = arith.constant 0 : index
    %146 = vector.load %arg9[%c0_100, %c0_101] : memref<72x256xbf16, #tpu.memory_space<vmem>>, vector<72x256xbf16>
    %cst_102 = arith.constant dense<0.000000e+00> : vector<8x256xf32>
    %147 = tpu.matmul %145, %146, %cst_102 {dimension_numbers = #tpu.dot_dimension_numbers<[1], [0], [0], [1], [0, 0, 1, 1], [], []>} : vector<8x72xbf16>, vector<72x256xbf16>, vector<8x256xf32> -> vector<8x256xf32>
    %cst_103 = arith.constant 0.000000e+00 : f32
    %148 = vector.broadcast %cst_103 : f32 to vector<8x256xf32>
    %149 = arith.maximumf %147, %148 : vector<8x256xf32>
    %c0_104 = arith.constant 0 : index
    %c0_105 = arith.constant 0 : index
    %c0_106 = arith.constant 0 : index
    %150 = vector.load %arg5[%c0_104, %c0_105, %c0_106] : memref<1x8x256xf32, #tpu.memory_space<vmem>>, vector<1x8x256xf32>
    %151 = vector.shape_cast %150 : vector<1x8x256xf32> to vector<8x256xf32>
    %152 = vector.shape_cast %149 : vector<8x256xf32> to vector<1x8x256xf32>
    tpu.vector_store %arg5[%c0_104, %c0_105, %c0_106], %152 {strides = array<i32>} : memref<1x8x256xf32, #tpu.memory_space<vmem>>, vector<1x8x256xf32>,
    return
  }
  func.func @transform_0(%arg0: i32) -> (i32, i32, i32) {
    %c0_i32 = arith.constant 0 : i32
    %c0_i32_0 = arith.constant 0 : i32
    %c0_i32_1 = arith.constant 0 : i32
    return %arg0, %c0_i32, %c0_i32_0 : i32, i32, i32
  }
  func.func @transform_1(%arg0: i32) -> (i32, i32, i32) {
    %c0_i32 = arith.constant 0 : i32
    %c0_i32_0 = arith.constant 0 : i32
    %c0_i32_1 = arith.constant 0 : i32
    return %arg0, %c0_i32, %c0_i32_0 : i32, i32, i32
  }
  func.func @transform_2(%arg0: i32) -> (i32, i32) {
    %c0_i32 = arith.constant 0 : i32
    %c0_i32_0 = arith.constant 0 : i32
    %c0_i32_1 = arith.constant 0 : i32
    return %c0_i32, %c0_i32_0 : i32, i32
  }
  func.func @transform_3(%arg0: i32) -> (i32, i32) {
    %c0_i32 = arith.constant 0 : i32
    %c0_i32_0 = arith.constant 0 : i32
    %c0_i32_1 = arith.constant 0 : i32
    return %c0_i32, %c0_i32_0 : i32, i32
  }
  func.func @transform_4(%arg0: i32) -> (i32, i32, i32) {
    %c0_i32 = arith.constant 0 : i32
    %c0_i32_0 = arith.constant 0 : i32
    %c0_i32_1 = arith.constant 0 : i32
    return %arg0, %c0_i32, %c0_i32_0 : i32, i32, i32
  }
}

</mosaic_0001>

<bundles_post_ra>
// kernel: tpu_custom_call.1
= control target key start
LH: loop header
LB: loop body
LE: loop exit
PB: predicated region body
PF: predicated region fallthrough
CT: control target
= control target key end

     0   :  { %s2404_s0 = inlined_call_operand.hbm [shape: f32[2,8,256], index: 0, kind: input, shape index: {}]   ;;  %s2405_s1 = inlined_call_operand.hbm [shape: f32[2,4,256], index: 1, kind: input, shape index: {}]   ;;  %s2406_s2 = inlined_call_operand.hbm [shape: bf16[8,144], index: 2, kind: input, shape index: {}]   ;;  %s2407_s3 = inlined_call_operand.vmem [shape: bf16[8,72], index: 3, kind: input, shape index: {}]   ;;  %s2408_s4 = inlined_call_operand.hbm [shape: f32[2,8,256], index: 4, kind: output, shape index: {}]  }
   0x1   :  { %2414 = sst [smem:[#allocation17_spill]] %s2404_s0 }
   0x2   :  { %9 = vsyncpa [#allocation7], 0 }
   0x3   :  { %11 = vsyncpa [#allocation7 + $0x1], 0 }
   0x4   :  { %12 = vsyncpa [#allocation10], 0 }
   0x5   :  { %14 = vsyncpa [#allocation10 + $0x1], 0 }
   0x6   :  { %15 = vsyncpa [#allocation8], 0 }
   0x7   :  { %17 = vsyncpa [#allocation8 + $0x1], 0  ;;  %s1929_s15 = smov 0   ;;  %s1931_s16 = smov 0  }
   0x8   :  { %s1933_s17 = smov 0   ;;  %s1935_s18 = smov 0  }
   0x9 LB: > { %s1950_s19 = sadd.s32 4294967295, %s1887_s18   ;;  %s1347_s20 = sadd.s32 4294967294, %s1887_s18   ;;  %s1887_s18 = sphi %s1935_s18, %s2450_s18   ;;  %s1883_s17 = sphi %s1933_s17, %s2449_s17   ;;  %s1879_s16 = sphi %s1931_s16, %s2448_s16   ;;  %s1875_s15 = sphi %s1929_s15, %s2447_s15  }
   0xa   : > { %s1954_s21 = sadd.s32 1, %s1887_s18   ;;  %s30_s22 = sadd.s32 1, %s1883_s17 }
   0xb   : > { %s27_s23 = ssub.s32 %s1887_s18, %s1954_s21  ;;  %p37_p0 = scmp.ne.s32.totalorder %s1883_s17, %s1879_s16 }
   0xc   : > { %p28_p1 = scmp.eq.s32.totalorder %s27_s23, 0  ;;  %p43_p2 = scmp.ne.s32.totalorder %s1879_s16, %s1875_s15 }
   0xd   : > { %p2412_p3 = scmp.eq.s32.totalorder %s1950_s19, 0  ;;  %p135_p4 = scmp.eq.s32.totalorder %s1950_s19, 1 }
   0xe   : > { %s1966_s24 = scalar_select %p28_p1, %s1883_s17, %s30_s22  }
   0xf   : > { %p1970_p5 = por %p2412_p3, %p43_p2  ;;  %p1977_p6 = por %p135_p4, %p37_p0 }
  0x10   : > { %p141_p7 = scmp.eq.s32.totalorder %s1347_s20, 1  ;;  %p1348_p8 = scmp.ge.s32.totalorder %s1887_s18, 1 }
  0x11   : > { %s2415_s25 = scalar_select %p1970_p5, 1, 0 }
  0x12   : > { %s2416_s26 = scalar_select %p1977_p6, 1, 0 }
  0x13   : > { %p148_p9 = scmp.lt.s32.totalorder %s1887_s18, 3  ;;  %p1983_p10 = por %p141_p7, %p43_p2 }
  0x14   : > { %s1889_s29 = smov [#allocation11]   ;;  %p38_p1 = scmp.eq.s32.totalorder %s1887_s18, 0 }
  0x15   : > { %s2417_s27 = scalar_select %p1983_p10, 1, 0 }
  0x16   : > { %p1987_p11 = pnand %p1348_p8, %p148_p9  ;;  %s161_s30 = sshll.u32 %s1889_s29, 4  ;;  %s162_s30 = int_to_ptr.vmem [resolvable:$true] %s161_s30 }
  0x17   : > { %s1997_s5 = sand.u32 1, %s1883_s17   ;;  %p2004_p7 = por %p38_p1, %p37_p0 }
  0x18   : > { %s2418_s28 = scalar_select %p1987_p11, 1, 0 }
  0x19   : > { %p1547_p13 = pneg %p1987_p11  ;;  %s1351_s7 = sshll.u32 %s1997_s5, 4 }
  0x1a   : > { %s1744_s8 = scalar_lea.vmem %s162_s30, 128  ;;  %p1752_p6 = scmp.lt.s32.totalorder %s162_s30, %s162_s30 }
  0x1b   : > { %p1548_p2 = pnand %p1547_p13, %p2412_p3  ;;  %p1745_p9 = scmp.ne.s32.totalorder %s162_s30, %s1744_s8 }
  0x1c   : > { %p1753_p5 = scmp.lt.s32.totalorder %s1744_s8, %s1744_s8 }
  0x1d   : > { %p1735_p8 = pneg %p1548_p2 }
  0x1e   : > { %p1754_p11 = por %p1753_p5, %p1752_p6 }
  0x1f   : > { %p1747_p10 = pnand %p1745_p9, %p1735_p8 }
  0x21   : > { %p1748_p12 = pneg %p1747_p10 }
  0x23   : > { %p1755_p4 = pnand %p1754_p11, %p1748_p12 }
  0x25   : > { %1758 = shalt.err (!%p1755_p4)
}
  0x26   : > { %1550 = dma.hbm_to_vmem [thread:$0]  (!%p1548_p2), %s2406_s2, 128, %s162_s30, [#allocation10]  }
  0x27   : > { %s1433_s11 = sshll.u32 %s1887_s18, 8  ;;  %s179_s12 = scalar_lea.vmem [#allocation6], %s1351_s7 }
  0x28   : > { %s187_s13 = sshll.u32 %s179_s12, 4  ;;  %s2420_s0 = sld [smem:[#allocation17_spill]]  ;;  %s2018_s13 = int_to_ptr.vmem [resolvable:$true] %s187_s13 }
  0x29   : > { %p2421_p0 = scmp.lt.s32.totalorder %s1887_s18, 2  ;;  %s194_s29 = sand.u32 1, %s1887_s18  }
  0x2a   : > { %s1354_s30 = sshll.u32 %s1997_s5, 3  ;;  %s176_s7 = scalar_lea.sflag [#allocation7], %s1997_s5 }
  0x2b   : > { %p2024_p5 = pnand %p2421_p0, %p2004_p7 }
  0x2d   : > { %p1761_p10 = pneg %p2024_p5 }
  0x2e   : > { %s2016_s22 = scalar_lea.hbm %s2420_s0, %s1433_s11  ;;  %s1764_s10 = scalar_lea.hbm %s2420_s0, 512 }
  0x2f   : > { %s1759_s8 = scalar_lea.hbm %s2016_s22, 256  ;;  %p1765_p13 = scmp.lt.s32.totalorder %s2016_s22, %s2420_s0 }
  0x30   : > { %p1760_p6 = scmp.ne.s32.totalorder %s2016_s22, %s1759_s8  ;;  %p1766_p1 = scmp.lt.s32.totalorder %s1764_s10, %s1759_s8 }
  0x32   : > { %p1762_p11 = pnand %p1761_p10, %p1760_p6  ;;  %p1767_p4 = por %p1766_p1, %p1765_p13 }
  0x34   : > { %p1763_p12 = pneg %p1762_p11 }
  0x36   : > { %p1768_p2 = pnand %p1767_p4, %p1763_p12 }
  0x38   : > { %1771 = shalt.err (!%p1768_p2)
}
  0x39   : > { %s1772_s5 = scalar_lea.vmem %s2018_s13, 256  ;;  %s1890_s14 = smov [#allocation6]  }
  0x3a   : > { %p1773_p7 = scmp.ne.s32.totalorder %s2018_s13, %s1772_s5  ;;  %s1777_s20 = sshll.u32 %s1890_s14, 4  ;;  %s1778_s20 = int_to_ptr.vmem [resolvable:$false] %s1777_s20 }
  0x3b   : > { %s1779_s9 = scalar_lea.vmem %s1778_s20, 512  ;;  %p1780_p0 = scmp.lt.s32.totalorder %s2018_s13, %s1778_s20 }
  0x3c   : > { %p1775_p8 = pnand %p1773_p7, %p1761_p10  ;;  %p1781_p6 = scmp.lt.s32.totalorder %s1779_s9, %s1772_s5 }
  0x3e   : > { %p1776_p9 = pneg %p1775_p8  ;;  %p1782_p11 = por %p1781_p6, %p1780_p0 }
  0x40   : > { %p1783_p13 = pnand %p1782_p11, %p1776_p9 }
  0x42   : > { %1786 = shalt.err (!%p1783_p13)
}
  0x43   : > { %1554 = dma.hbm_to_vmem [thread:$0]  (!%p2024_p5), %s2016_s22, 256, %s2018_s13, %s176_s7  }
  0x44   : > { %s1434_s8 = sshll.u32 %s1887_s18, 7  ;;  %s198_s6 = scalar_lea.vmem [#allocation9], %s1354_s30 }
  0x45   : > { %s206_s10 = sshll.u32 %s198_s6, 4  ;;  %s204_s14 = scalar_lea.hbm %s2405_s1, %s1434_s8  ;;  %s207_s10 = int_to_ptr.vmem [resolvable:$true] %s206_s10 }
  0x46   : > { %s195_s5 = scalar_lea.sflag [#allocation10], %s194_s29  ;;  %s1787_s20 = scalar_lea.hbm %s204_s14, 128 }
  0x47   : > { %p1788_p12 = scmp.ne.s32.totalorder %s204_s14, %s1787_s20  ;;  %s1792_s13 = scalar_lea.hbm %s2405_s1, 256 }
  0x48   : > { %p1793_p2 = scmp.lt.s32.totalorder %s204_s14, %s2405_s1  ;;  %p1794_p7 = scmp.lt.s32.totalorder %s1792_s13, %s1787_s20 }
  0x49   : > { %p1790_p1 = pnand %p1788_p12, %p1761_p10 }
  0x4a   : > { %p1795_p8 = por %p1794_p7, %p1793_p2 }
  0x4b   : > { %p1791_p4 = pneg %p1790_p1 }
  0x4d   : > { %p1796_p9 = pnand %p1795_p8, %p1791_p4 }
  0x4f   : > { %1799 = shalt.err (!%p1796_p9)
}
  0x50   : > { %s1800_s7 = scalar_lea.vmem %s207_s10, 128  ;;  %s1891_s29 = smov [#allocation9]  }
  0x51   : > { %p1801_p0 = scmp.ne.s32.totalorder %s207_s10, %s1800_s7  ;;  %s1805_s8 = sshll.u32 %s1891_s29, 4  ;;  %s1806_s8 = int_to_ptr.vmem [resolvable:$false] %s1805_s8 }
  0x52   : > { %s1807_s0 = scalar_lea.vmem %s1806_s8, 256  ;;  %p1808_p13 = scmp.lt.s32.totalorder %s207_s10, %s1806_s8 }
  0x53   : > { %p1803_p6 = pnand %p1801_p0, %p1761_p10  ;;  %p1809_p12 = scmp.lt.s32.totalorder %s1807_s0, %s1800_s7 }
  0x55   : > { %p1804_p11 = pneg %p1803_p6  ;;  %p1810_p1 = por %p1809_p12, %p1808_p13 }
  0x57   : > { %p1811_p3 = pnand %p1810_p1, %p1804_p11 }
  0x59   : > { %1814 = shalt.err (!%p1811_p3)
}
  0x5a   : > { %1557 = dma.hbm_to_vmem [thread:$0]  (!%p2024_p5), %s204_s14, 128, %s207_s10, %s195_s5  }
  0x5b   : > { %p2423_p4 = scmp.ne.s32.totalorder %s2418_s28, 0 }
  0x5c   : > { %s2078_s6 = sand.u32 (!%p2423_p4), 1, %s1879_s16   ;;  %p2424_p10 = scmp.ne.s32.totalorder (!%p2423_p4), %s2415_s25, 0 }
  0x5d   : > { %215 = sbr.rel (%p2423_p4) target bundleno = 852 (0x354), region = 36  ;;  %s1358_s11 = sshll.u32 (!%p2423_p4), %s2078_s6, 4 }
  0x5e   : > { %s218_s12 = scalar_lea.sflag (!%p2423_p4), [#allocation7], %s2078_s6  ;;  %s221_s20 = scalar_lea.vmem (!%p2423_p4), [#allocation6], %s1358_s11 }
  0x62   : > { %1858 = dma.done.wait (%p2424_p10), %s218_s12, 256  }
  0x63   : > { %1860 = vsyncadd (%p2424_p10), %s218_s12, 4294967040  ;;  %s226_s28 = sand.u32 1, %s1950_s19   ;;  %s1359_s23 = sshll.u32 %s2078_s6, 3 }
  0x64   : > { %s227_s10 = scalar_lea.sflag [#allocation10], %s226_s28  ;;  %s230_s14 = scalar_lea.vmem [#allocation9], %s1359_s23 }
  0x65   : > { %1862 = dma.done.wait (%p2424_p10), %s227_s10, 128  }
  0x66   : > { %1864 = vsyncadd (%p2424_p10), %s227_s10, 4294967168  ;;  %p2425_p3 = scmp.eq.s32.totalorder %s1950_s19, 0 }
  0x68   : > { %1866 = dma.done.wait (%p2425_p3), [#allocation10], 128   ;;  %p2426_p5 = pmov %p2425_p3 }
  0x69   : > { %vm268_vm0 = vcmask 138240   ;;  %v1892_v0 = vmov 0.0   ;;  %vm265_vm1 = vcmask 1048440   ;;  %v2101_v1 = vld [vmem:[%s221_s20 + $0x8] sm:$0xff]  ;;  %v2103_v2 = vld [vmem:[%s221_s20] sm:$0xff]  ;;  %s1893_s25 = smov 112   ;;  %v285_v32 = vlaneseq }
  0x6a   : > { %1868 = vsyncadd (%p2426_p5), [#allocation10], 4294967168  ;;  %270 = vst.msk [vmem:[#allocation2 + $0x38] sm:$0xff] %vm268_vm0, %v1892_v0  ;;  %v279_v3 = vld [vmem:[%s230_s14] sm:$0xff]  ;;  %s1894_s5 = smov 113   ;;  %s1895_s9 = smov 127   ;;  %v1451_v14 = vpack.c.bf16 %v2101_v1, %v2103_v2  ;;  %v1640_v16 = vpack.i.bf16 %v2101_v1, %v2103_v2  ;;  %v1438_v24 = vpack.c.bf16 %v2101_v1, %v2101_v1 }
  0x6b   : > { %269 = vst.msk [vmem:[#allocation2 + $0x18] sm:$0xff] %vm268_vm0, %v1892_v0  ;;  %272 = vst.msk [vmem:[#allocation3 + $0x18] sm:$0xff] %vm268_vm0, %v1892_v0  ;;  %v281_v6 = vcombine.high %v279_v3, %v279_v3  ;;  %s1896_s13 = smov 1   ;;  %s1897_s22 = smov 15   ;;  %v2153_v27 = vld [vmem:[#allocation11] sm:$0xff]  ;;  %vm2413_vm2 = vcmask 130048  }
  0x6c   : > { %273 = vst [vmem:[#allocation2 + $0x28] sm:$0xf0] %v1892_v0  ;;  %274 = vst [vmem:[#allocation2 + $0x30] sm:$0xf0] %v1892_v0  ;;  %s1898_s30 = smov 16   ;;  %s1899_s7 = smov 17   ;;  %v1385_v28 = vcombine.high %v2153_v27, %v2153_v27 }
  0x6d   : > { %266 = vst.msk [vmem:[#allocation2] sm:$0xff] %vm265_vm1, %v1892_v0  ;;  %267 = vst.msk [vmem:[#allocation2 + $0x20] sm:$0xff] %vm265_vm1, %v1892_v0  ;;  %s1900_s29 = smov 111   ;;  %v286_v35 = vand.u32 127, %v285_v32  ;;  %vm613_vm3 = vcmask 924672   ;;  %vm404_vm4 = vcmask 1043456  }
  0x6e   : > { %271 = vst.msk [vmem:[#allocation3] sm:$0xff] %vm265_vm1, %v1892_v0  ;;  %283 = vst [vmem:[#allocation2 + $0x28] sm:$0xf] %v279_v3  ;;  %1404 = vmatprep.mubr.msk.bf16.mxu0 %vm2413_vm2, %v1385_v28  ;;  %vm675_vm5 = vcmask 916480   ;;  %vm562_vm6 = vcmask 1039360   ;;  %vm493_vm14 = vcmask 7168  }
  0x6f   : > { %284 = vst [vmem:[#allocation2 + $0x30] sm:$0xf] %v281_v6  ;;  %v287_v37 = vadd.s32 128, %v286_v35  ;;  %v292_v48 = vand.u32 15, %v286_v35  ;;  %vm442_vm1 = vcmask 121856   ;;  %s1468_s12 = sshll.u32 %s1950_s19, 8 }
  0x70   : > { %s263_s20 = scalar_lea.vmem [#allocation12], %s1358_s11  ;;  %s2361_s14 = scalar_lea.hbm %s2408_s4, %s1468_s12 }
  0x71   : > { %v645_v4 = vld [vmem:[#allocation2 + $0x38] sm:$0xff]  ;;  %v299_v40 = vand.u32 15, %v287_v37  ;;  %vm2177_vm8 = vcmp.ge.s32.totalorder %v292_v48, 1  ;;  %vm2213_vm13 = vcmp.le.s32.totalorder %v292_v48, 14  ;;  %s1245_s28 = sshll.u32 %s263_s20, 4  ;;  %s1231_s19 = scalar_lea.sflag [#allocation8], %s2078_s6  ;;  %s2363_s28 = int_to_ptr.vmem [resolvable:$true] %s1245_s28 }
  0x72   : > { %v642_v5 = vld [vmem:[#allocation2 + $0x18] sm:$0xff]  ;;  %v1454_v7 = vpack.c.bf16 %v645_v4, %v645_v4  ;;  %vm2201_vm11 = vmpackc.low %vm2177_vm8, %vm2177_vm8  ;;  %s1815_s11 = scalar_lea.vmem %s2363_s28, 256  ;;  %p2444_p7 = scmp.ne.s32.totalorder %s2416_s26, 0 }
  0x73   : > { %v1452_v8 = vpack.c.bf16 %v642_v5, %v642_v5  ;;  %v1610_v9 = vpack.i.bf16 %v642_v5, %v2101_v1  ;;  %v2162_v29 = vld [vmem:[#allocation3 + $0x18] sm:$0xff]  ;;  %vm2171_vm7 = vcmp.ge.s32.totalorder %v299_v40, 1  ;;  %vm2181_vm9 = vcmp.le.s32.totalorder %v299_v40, 14  ;;  %vm2226_vm15 = vmpackc.low %vm2213_vm13, %vm2213_vm13  ;;  %p1816_p2 = scmp.ne.s32.totalorder %s2363_s28, %s1815_s11 }
  0x74   : > { %668 = vrot.lane.b32.xlu1 %v1454_v7, %s1893_s25  ;;  %v469_v19 = vld [vmem:[#allocation2] sm:$0xff]  ;;  %vm2190_vm10 = vmpackc.low %vm2171_vm7, %vm2171_vm7 }
  0x75   : > { %664 = vrot.lane.b32.xlu0 %v1452_v8, %s1893_s25  ;;  %v2110_v10 = vld [vmem:[#allocation2 + $0x28] sm:$0xff]  ;;  %v472_v20 = vld [vmem:[#allocation2 + $0x20] sm:$0xff]  ;;  %v1437_v23 = vpack.c.bf16 %v2103_v2, %v469_v19  ;;  %vm2209_vm12 = vmpackc.low %vm2181_vm9, %vm2181_vm9  ;;  %p1817_p8 = pnand %p1816_p2, %p2444_p7 }
  0x76   : > { %v1615_v11 = vpack.i.bf16 %v2110_v10, %v2103_v2  ;;  %v2114_v12 = vld [vmem:[#allocation2 + $0x30] sm:$0xff]  ;;  %v1475_v21 = vpack.c.bf16 %v2110_v10, %v2103_v2  ;;  %v1650_v22 = vpack.i.bf16 %v472_v20, %v469_v19  ;;  %v1439_v25 = vpack.c.bf16 %v2110_v10, %v472_v20 }
  0x77   : > { %v1625_v13 = vpack.i.bf16 %v645_v4, %v2114_v12  ;;  %v1453_v15 = vpack.c.bf16 %v2114_v12, %v2110_v10  ;;  %v1476_v17 = vpack.c.bf16 %v2114_v12, %v2101_v1  ;;  %v1645_v18 = vpack.i.bf16 %v2114_v12, %v2110_v10  ;;  %p1818_p9 = pneg %p1817_p8 }
  0x78   : > { %1621 = vrot.lane.b32.xlu1 %v1610_v9, %s1895_s9  ;;  %v1440_v26 = vpack.c.bf16 %v2114_v12, %v2114_v12  ;;  %v1466_v20 = vpack.c.bf16 %v2162_v29, %v2162_v29 }
  0x79   : > { %1611 = vrot.lane.b32.xlu0 %v1610_v9, %s1894_s5 }
  0x7c   : > { %1626 = vrot.lane.b32.xlu1 %v1625_v13, %s1894_s5 }
  0x7d   : > { %1616 = vrot.lane.b32.xlu0 %v1615_v11, %s1894_s5 }
  0x80   : > { %666 = vrot.lane.b32.xlu1 %v1453_v15, %s1893_s25 }
  0x81   : > { %662 = vrot.lane.b32.xlu0 %v1451_v14, %s1893_s25 }
  0x84   : > { %1636 = vrot.lane.b32.xlu1 %v1615_v11, %s1895_s9 }
  0x85   : > { %1631 = vrot.lane.b32.xlu0 %v1625_v13, %s1895_s9 }
  0x88   : > { %1646 = vrot.lane.b32.xlu1 %v1645_v18, %s1896_s13 }
  0x89   : > { %1641 = vrot.lane.b32.xlu0 %v1640_v16, %s1896_s13 }
  0x8c   : > { %1656 = vrot.lane.b32.xlu1 %v1640_v16, %s1897_s22 }
  0x8d   : > { %1651 = vrot.lane.b32.xlu0 %v1650_v22, %s1896_s13 }
  0x90   : > { %392 = vrot.lane.b32.xlu1 %v1437_v23, %s1898_s30 }
  0x91   : > { %1661 = vrot.lane.b32.xlu0 %v1645_v18, %s1897_s22 }
  0x94   : > { %396 = vrot.lane.b32.xlu1 %v1439_v25, %s1898_s30 }
  0x95   : > { %394 = vrot.lane.b32.xlu0 %v1438_v24, %s1898_s30 }
  0x98   : > { %1666 = vrot.lane.b32.xlu1 %v1650_v22, %s1897_s22 }
  0x99   : > { %398 = vrot.lane.b32.xlu0 %v1440_v26, %s1898_s30 }
  0x9c   : > { %1676 = vrot.lane.b32.xlu1 %v1645_v18, %s1899_s7 }
  0x9d   : > { %1671 = vrot.lane.b32.xlu0 %v1640_v16, %s1899_s7 }
  0xa0   : > { %1686 = vrot.lane.b32.xlu1 %v1610_v9, %s1900_s29 }
  0xa1   : > { %1681 = vrot.lane.b32.xlu0 %v1650_v22, %s1899_s7 }
  0xa4   : > { %1696 = vrot.lane.b32.xlu1 %v1615_v11, %s1900_s29 }
  0xa5   : > { %1691 = vrot.lane.b32.xlu0 %v1625_v13, %s1900_s29 }
  0xa8   : > { %1102 = vrot.lane.b32.xlu1 %v2162_v29, %s1900_s29 }
  0xac   : > { %1051 = vrot.lane.b32.xlu1 %v2162_v29, %s1894_s5 }
  0xb0   : > { %1084 = vrot.lane.b32.xlu1 %v1466_v20, %s1893_s25 }
  0xe6   : > { %v669_v30 = vpop.permute.xlu1 %668 }
  0xe7   : > { %v665_v31 = vpop.permute.xlu0 %664  ;;  %v673_v46 = vrot.slane %v669_v30, 4 }
  0xe8   : > { %v671_v41 = vrot.slane %v665_v31, 4 }
  0xea   : > { %v1622_v34 = vpop.permute.xlu1 %1621 }
  0xeb   : > { %v1612_v33 = vpop.permute.xlu0 %1611  ;;  %v1624_v6 = vunpack.i.h.bf16 %v1622_v34  ;;  %v1623_v7 = vunpack.i.l.bf16 %v1622_v34 }
  0xec   : > { %v1614_v49 = vunpack.i.h.bf16 %v1612_v33  ;;  %v1613_v50 = vunpack.i.l.bf16 %v1612_v33 }
  0xed   : > { %v564_v22 = vsel %vm562_vm6, %v1623_v7, %v1624_v6 }
  0xee   : > { %v1627_v38 = vpop.permute.xlu1 %1626  ;;  %v615_v5 = vsel %vm613_vm3, %v1613_v50, %v1614_v49 }
  0xef   : > { %v1617_v36 = vpop.permute.xlu0 %1616  ;;  %v1629_v42 = vunpack.i.h.bf16 %v1627_v38  ;;  %v1628_v43 = vunpack.i.l.bf16 %v1627_v38 }
  0xf0   : > { %v1618_v51 = vunpack.i.l.bf16 %v1617_v36  ;;  %v1619_v53 = vunpack.i.h.bf16 %v1617_v36 }
  0xf1   : > { %v617_v58 = vsel %vm613_vm3, %v1628_v43, %v1629_v42 }
  0xf2   : > { %v667_v45 = vpop.permute.xlu1 %666  ;;  %v614_v8 = vsel %vm613_vm3, %v1618_v51, %v1613_v50  ;;  %v616_v11 = vsel %vm613_vm3, %v1619_v53, %v1628_v43  ;;  %v1484_v13 = vpack.c.bf16 %v617_v58, %v615_v5 }
  0xf3   : > { %v663_v39 = vpop.permute.xlu0 %662  ;;  %v672_v47 = vrot.slane %v667_v45, 4  ;;  %v1487_v23 = vpack.c.bf16 %v616_v11, %v614_v8 }
  0xf4   : > { %v670_v44 = vrot.slane %v663_v39, 4 }
  0xf5   : > { %v677_v56 = vsel %vm404_vm4, %v672_v47, %v673_v46 }
  0xf6   : > { %v674_v52 = vsel %vm404_vm4, %v670_v44, %v671_v41  ;;  %v1637_v61 = vpop.permute.xlu1 %1636  ;;  %v678_v62 = vsel %vm675_vm5, %v667_v45, %v677_v56 }
  0xf7   : > { %v1632_v54 = vpop.permute.xlu0 %1631  ;;  %v676_v55 = vsel %vm675_vm5, %v663_v39, %v674_v52  ;;  %v1639_v14 = vunpack.i.h.bf16 %v1637_v61  ;;  %v1638_v15 = vunpack.i.l.bf16 %v1637_v61 }
  0xf8   : > { %v1634_v59 = vunpack.i.h.bf16 %v1632_v54  ;;  %v1633_v60 = vunpack.i.l.bf16 %v1632_v54  ;;  %v1401_v63 = vcombine.high %v676_v55, %v678_v62  ;;  %v1400_v0 = vcombine.low %v676_v55, %v678_v62 }
  0xf9   : > { %v563_v30 = vsel %vm562_vm6, %v1638_v15, %v1623_v7 }
  0xfa   : > { %853 = vmatprep.subr.bf16.mxu0 %v1401_v63  ;;  %v566_v18 = vsel %vm562_vm6, %v1633_v60, %v1634_v59  ;;  %v1647_v19 = vpop.permute.xlu1 %1646  ;;  %v565_v28 = vsel %vm562_vm6, %v1639_v14, %v1633_v60 }
  0xfb   : > { %v1642_v16 = vpop.permute.xlu0 %1641  ;;  %854 = vmatpush1.bf16.msra.mxu0 %v1400_v0  ;;  %v1490_v26 = vpack.c.bf16 %v566_v18, %v564_v22  ;;  %v1649_v34 = vunpack.i.h.bf16 %v1647_v19  ;;  %v1648_v35 = vunpack.i.l.bf16 %v1647_v19  ;;  %v1493_v38 = vpack.c.bf16 %v565_v28, %v563_v30 }
  0xfc   : > { %1485 = vmatprep.subr.msk.bf16.mxu0 %vm2190_vm10, %v1484_v13  ;;  %v1644_v32 = vunpack.i.h.bf16 %v1642_v16  ;;  %v1643_v33 = vunpack.i.l.bf16 %v1642_v16 }
  0xfd   : > { %v497_v43 = vsel %vm493_vm14, %v1648_v35, %v1649_v34 }
  0xfe   : > { %v1657_v36 = vpop.permute.xlu1 %1656  ;;  %v495_v42 = vsel %vm493_vm14, %v1643_v33, %v1644_v32 }
  0xff   : > { %v1652_v31 = vpop.permute.xlu0 %1651  ;;  %1488 = vmatpush1.bf16.msk.msra.mxu0 %vm2201_vm11, %v1487_v23  ;;  %v1659_v47 = vunpack.i.h.bf16 %v1657_v36  ;;  %v1658_v48 = vunpack.i.l.bf16 %v1657_v36  ;;  %v1496_v49 = vpack.c.bf16 %v497_v43, %v495_v42 }
 0x100   : > { %1491 = vmatprep.subr.msk.bf16.mxu0 %vm2209_vm12, %v1490_v26  ;;  %v1654_v39 = vunpack.i.h.bf16 %v1652_v31  ;;  %v1653_v40 = vunpack.i.l.bf16 %v1652_v31 }
 0x101   : > { %v444_v1 = vsel %vm442_vm1, %v1658_v48, %v1659_v47 }
 0x102   : > { %v393_v46 = vpop.permute.xlu1 %392  ;;  %v496_v50 = vsel %vm493_vm14, %v1654_v39, %v1648_v35  ;;  %v494_v51 = vsel %vm493_vm14, %v1653_v40, %v1643_v33 }
 0x103   : > { %v1662_v41 = vpop.permute.xlu0 %1661  ;;  %1494 = vmatpush1.bf16.msk.msra.mxu0 %vm2226_vm15, %v1493_v38  ;;  %v1499_v12 = vpack.c.bf16 %v496_v50, %v494_v51  ;;  %v1384_v50 = vcombine.low %v2153_v27, %v2153_v27 }
 0x104   : > { %v1664_v44 = vunpack.i.h.bf16 %v1662_v41  ;;  %v1663_v45 = vunpack.i.l.bf16 %v1662_v41  ;;  %859 = vmatprep.subr.bf16.mxu0 %v1476_v17  ;;  %v400_v17 = vrot.slane %v393_v46, 4 }
 0x106   : > { %v446_v53 = vsel %vm442_vm1, %v1663_v45, %v1664_v44  ;;  %v397_v55 = vpop.permute.xlu1 %396 }
 0x107   : > { %v395_v52 = vpop.permute.xlu0 %394  ;;  %860 = vmatpush1.bf16.msra.mxu0 %v1475_v21  ;;  %v1502_v56 = vpack.c.bf16 %v446_v53, %v444_v1  ;;  %v402_v60 = vrot.slane %v397_v55, 4 }
 0x108   : > { %v401_v54 = vrot.slane %v395_v52, 4  ;;  %1497 = vmatprep.subr.msk.bf16.mxu0 %vm2190_vm10, %v1496_v49 }
 0x10a   : > { %v405_v59 = vsel %vm404_vm4, %v400_v17, %v401_v54  ;;  %v1667_v2 = vpop.permute.xlu1 %1666 }
 0x10b   : > { %v399_v58 = vpop.permute.xlu0 %398  ;;  %1500 = vmatpush1.bf16.msk.msra.mxu0 %vm2201_vm11, %v1499_v12  ;;  %v1669_v10 = vunpack.i.h.bf16 %v1667_v2  ;;  %v1668_v21 = vunpack.i.l.bf16 %v1667_v2  ;;  %v407_v6 = vsel %vm2413_vm2, %v393_v46, %v405_v59  ;;  %v976_v12 = vld [vmem:[#allocation3] sm:$0xff] }
 0x10c   : > { %v403_v61 = vrot.slane %v399_v58, 4  ;;  %1503 = vmatprep.subr.msk.bf16.mxu0 %vm2209_vm12, %v1502_v56  ;;  %v1901_v58 = vmov 0  }
 0x10d   : > { %v445_v63 = vsel %vm442_vm1, %v1669_v10, %v1663_v45  ;;  %v443_v0 = vsel %vm442_vm1, %v1668_v21, %v1658_v48  ;;  %1217 = vmatprep.mubr.bf16.mxu1 %v1901_v58 }
 0x10e   : > { %v408_v62 = vsel %vm404_vm4, %v402_v60, %v403_v61  ;;  %v1505_v8 = vpack.c.bf16 %v445_v63, %v443_v0  ;;  %v1677_v14 = vpop.permute.xlu1 %1676 }
 0x10f   : > { %v1672_v5 = vpop.permute.xlu0 %1671  ;;  %v409_v7 = vsel %vm2413_vm2, %v397_v55, %v408_v62  ;;  %v1679_v16 = vunpack.i.h.bf16 %v1677_v14  ;;  %v1678_v18 = vunpack.i.l.bf16 %v1677_v14  ;;  %vm707_vm2 = vcmask 908288  }
 0x110   : > { %v1674_v11 = vunpack.i.h.bf16 %v1672_v5  ;;  %v1673_v13 = vunpack.i.l.bf16 %v1672_v5  ;;  %v1389_v15 = vcombine.high %v407_v6, %v409_v7  ;;  %1506 = vmatpush1.bf16.msk.msra.mxu0 %vm2226_vm15, %v1505_v8  ;;  %v1388_v32 = vcombine.low %v407_v6, %v409_v7 }
 0x111   : > { %v347_v22 = vsel %vm268_vm0, %v1678_v18, %v1679_v16 }
 0x112   : > { %v345_v19 = vsel %vm268_vm0, %v1673_v13, %v1674_v11  ;;  %865 = vmatprep.subr.bf16.mxu0 %v1389_v15  ;;  %v1687_v28 = vpop.permute.xlu1 %1686 }
 0x113   : > { %v1682_v23 = vpop.permute.xlu0 %1681  ;;  %v1508_v26 = vpack.c.bf16 %v347_v22, %v345_v19  ;;  %v1689_v33 = vunpack.i.h.bf16 %v1687_v28  ;;  %v1688_v34 = vunpack.i.l.bf16 %v1687_v28 }
 0x114   : > { %v1684_v30 = vunpack.i.h.bf16 %v1682_v23  ;;  %v1683_v31 = vunpack.i.l.bf16 %v1682_v23  ;;  %866 = vmatpush1.bf16.msra.mxu0 %v1388_v32 }
 0x115   : > { %1509 = vmatprep.subr.msk.bf16.mxu0 %vm2190_vm10, %v1508_v26  ;;  %v709_v45 = vsel %vm707_vm2, %v1688_v34, %v1689_v33 }
 0x116   : > { %v346_v35 = vsel %vm268_vm0, %v1684_v30, %v1678_v18  ;;  %v344_v36 = vsel %vm268_vm0, %v1683_v31, %v1673_v13  ;;  %v1697_v40 = vpop.permute.xlu1 %1696 }
 0x117   : > { %v1511_v38 = vpack.c.bf16 %v346_v35, %v344_v36  ;;  %v1692_v39 = vpop.permute.xlu0 %1691  ;;  %v1699_v43 = vunpack.i.h.bf16 %v1697_v40  ;;  %v1698_v44 = vunpack.i.l.bf16 %v1697_v40 }
 0x118   : > { %v1694_v41 = vunpack.i.h.bf16 %v1692_v39  ;;  %v1693_v42 = vunpack.i.l.bf16 %v1692_v39 }
 0x119   : > { %1512 = vmatpush1.bf16.msk.msra.mxu0 %vm2201_vm11, %v1511_v38  ;;  %v708_v47 = vsel %vm707_vm2, %v1698_v44, %v1688_v34 }
 0x11a   : > { %v711_v46 = vsel %vm707_vm2, %v1693_v42, %v1694_v41  ;;  %v710_v48 = vsel %vm707_vm2, %v1699_v43, %v1693_v42  ;;  %v1103_v59 = vpop.permute.xlu1 %1102 }
 0x11b   : > { %v1514_v49 = vpack.c.bf16 %v711_v46, %v709_v45  ;;  %v1517_v9 = vpack.c.bf16 %v710_v48, %v708_v47 }
 0x11d   : > { %1515 = vmatprep.subr.msk.bf16.mxu0 %vm2209_vm12, %v1514_v49 }
 0x11e   : > { %1518 = vmatpush2.bf16.msk.msra.mxu0 %vm2226_vm15, %v1517_v9  ;;  %v1052_v60 = vpop.permute.xlu1 %1051 }
 0x121   : > { %886 = vmatmul.mubr.bf16.vlgmr.msra.gmra.mxu0 %v1384_v50 }
 0x122   : > { %v1085_v61 = vpop.permute.xlu1 %1084 }
 0x123   : > { %v1087_v34 = vrot.slane %v1085_v61, 4 }
 0x1e1   : > { %v887_v51 = vpop.f32.mrf.mxu0 }
 0x1e2   : > { %v2279_v52 = vmax.f32 %v887_v51, 0.0 }
 0x1e3   : > { %v889_v53 = vpop.f32.mrf.mxu0 }
 0x1e4   : > { %v2281_v54 = vmax.f32 %v889_v53, 0.0  ;;  %1020 = vrot.lane.b32.xlu1 %v2279_v52, %s1895_s9  ;;  %v1725_v56 = vpack.i.bf16 %v2279_v52, %v976_v12 }
 0x1e5   : > { %v891_v24 = vpop.f32.mrf.mxu0 }
 0x1e6   : > { %v1700_v27 = vpack.i.bf16 %v2281_v54, %v2279_v52  ;;  %v1710_v55 = vpack.i.bf16 %v2162_v29, %v2281_v54  ;;  %v1459_v1 = vpack.c.bf16 %v2281_v54, %v2281_v54  ;;  %v1465_v17 = vpack.c.bf16 %v2281_v54, %v2279_v52 }
 0x1e7   : > { %v892_v37 = vpop.f32.mrf.mxu0  ;;  %v1458_v29 = vpack.c.bf16 %v2279_v52, %v976_v12 }
 0x1e8   : > { %1701 = vrot.lane.b32.xlu0 %v1700_v27, %s1900_s29  ;;  %1721 = vrot.lane.b32.xlu1 %v1700_v27, %s1896_s13 }
 0x1ec   : > { %1706 = vrot.lane.b32.xlu0 %v1700_v27, %s1894_s5  ;;  %908 = vrot.lane.b32.xlu1 %v2281_v54, %s1899_s7 }
 0x1f0   : > { %1711 = vrot.lane.b32.xlu0 %v1710_v55, %s1895_s9  ;;  %941 = vrot.lane.b32.xlu1 %v1459_v1, %s1898_s30 }
 0x1f4   : > { %1716 = vrot.lane.b32.xlu0 %v1700_v27, %s1897_s22  ;;  %982 = vrot.lane.b32.xlu1 %v976_v12, %s1896_s13 }
 0x1f8   : > { %1082 = vrot.lane.b32.xlu0 %v1465_v17, %s1893_s25  ;;  %s1903_s25 = smov [#allocation12]  }
 0x1f9   : > { %s1819_s5 = sshll.u32 %s1903_s25, 4  ;;  %s1820_s5 = int_to_ptr.vmem [resolvable:$false] %s1819_s5 }
 0x1fa   : > { %s1821_s9 = scalar_lea.vmem %s1820_s5, 512  ;;  %p1822_p0 = scmp.lt.s32.totalorder %s2363_s28, %s1820_s5 }
 0x1fb   : > { %p1823_p6 = scmp.lt.s32.totalorder %s1821_s9, %s1815_s11 }
 0x1fc   : > { %1726 = vrot.lane.b32.xlu0 %v1725_v56, %s1899_s7 }
 0x1fd   : > { %p1824_p11 = por %p1823_p6, %p1822_p0 }
 0x1ff   : > { %p1825_p13 = pnand %p1824_p11, %p1818_p9 }
 0x200   : > { %939 = vrot.lane.b32.xlu0 %v1458_v29, %s1898_s30 }
 0x204   : > { %955 = vrot.lane.b32.xlu0 %v976_v12, %s1897_s22 }
 0x256   : > { %v1021_v62 = vpop.permute.xlu1 %1020 }
 0x25a   : > { %v1702_v2 = vpop.permute.xlu0 %1701  ;;  %v1722_v14 = vpop.permute.xlu1 %1721 }
 0x25b   : > { %v1704_v10 = vunpack.i.h.bf16 %v1702_v2  ;;  %v1703_v21 = vunpack.i.l.bf16 %v1702_v2  ;;  %v1724_v49 = vunpack.i.h.bf16 %v1722_v14  ;;  %v1723_v9 = vunpack.i.l.bf16 %v1722_v14 }
 0x25d   : > { %v1105_v63 = vsel %vm707_vm2, %v1704_v10, %v1103_v59  ;;  %v1104_v0 = vsel %vm707_vm2, %v1703_v21, %v1704_v10  ;;  %vm1902_vm2 = vmmov 1   ;;  %v989_v1 = vsel %vm493_vm14, %v1723_v9, %v1724_v49  ;;  %v1119_v21 = vld [vmem:[%s2407_s3] sm:$0xf] }
 0x25e   : > { %v1707_v5 = vpop.permute.xlu0 %1706  ;;  %v1109_v6 = vsel %vm2181_vm9, %v1105_v63, 0.0  ;;  %v1108_v7 = vsel %vm2213_vm13, %v1104_v0, 0.0  ;;  %v909_v26 = vpop.permute.xlu1 %908 }
 0x25f   : > { %v1524_v8 = vpack.c.bf16 %v1109_v6, %v1109_v6  ;;  %v1523_v11 = vpack.c.bf16 %v1108_v7, %v1108_v7  ;;  %v1709_v16 = vunpack.i.h.bf16 %v1707_v5  ;;  %v1708_v18 = vunpack.i.l.bf16 %v1707_v5 }
 0x261   : > { %1426 = vmatprep.subr.msk.bf16.mxu1 %vm404_vm4, %v1524_v8  ;;  %v1180_v13 = vsel %vm404_vm4, %v1523_v11, 0  ;;  %v1054_v22 = vsel %vm613_vm3, %v1709_v16, %v1052_v60  ;;  %v1053_v23 = vsel %vm613_vm3, %v1708_v18, %v1709_v16  ;;  %vm1525_vm3 = vmpackc.low %vm2181_vm9, %vm1902_vm2 }
 0x262   : > { %1192 = vmatpush1.bf16.msra.mxu1 %v1180_v13  ;;  %v1712_v15 = vpop.permute.xlu0 %1711  ;;  %v1057_v31 = vsel %vm2177_vm8, %v1053_v23, 0.0  ;;  %v1058_v32 = vsel %vm2171_vm7, %v1054_v22, 0.0  ;;  %v942_v40 = vpop.permute.xlu1 %941 }
 0x263   : > { %v1714_v28 = vunpack.i.h.bf16 %v1712_v15  ;;  %v1713_v30 = vunpack.i.l.bf16 %v1712_v15  ;;  %v1464_v36 = vpack.c.bf16 %v1058_v32, %v1057_v31  ;;  %v944_v37 = vrot.slane %v942_v40, 4 }
 0x265   : > { %v1027_v39 = vsel %vm562_vm6, %v1713_v30, %v1714_v28  ;;  %v1026_v50 = vsel %vm562_vm6, %v1021_v62, %v1713_v30  ;;  %vm2443_vm6 = vcmask 130048  }
 0x266   : > { %v1717_v19 = vpop.permute.xlu0 %1716  ;;  %v1526_v20 = vpack.c.bf16 %v1027_v39, %v2281_v54  ;;  %v1529_v12 = vpack.c.bf16 %v1026_v50, %v2279_v52  ;;  %v983_v54 = vpop.permute.xlu1 %982 }
 0x267   : > { %v1719_v41 = vunpack.i.h.bf16 %v1717_v19  ;;  %v1718_v42 = vunpack.i.l.bf16 %v1717_v19  ;;  %v988_v52 = vsel %vm493_vm14, %v983_v54, %v1723_v9 }
 0x269   : > { %v962_v24 = vsel %vm442_vm1, %v1718_v42, %v1719_v41 }
 0x26a   : > { %v1083_v33 = vpop.permute.xlu0 %1082  ;;  %v1532_v29 = vpack.c.bf16 %v989_v1, %v962_v24 }
 0x26b   : > { %v1086_v35 = vrot.slane %v1083_v33, 4 }
 0x26d   : > { %v1088_v38 = vsel %vm404_vm4, %v1086_v35, %v1087_v34 }
 0x26e   : > { %v1089_v43 = vsel %vm675_vm5, %v1083_v33, %v1088_v38  ;;  %v1727_v44 = vpop.permute.xlu0 %1726  ;;  %vm1528_vm5 = vmpackc.low %vm2213_vm13, %vm1902_vm2 }
 0x26f   : > { %v1422_v45 = vcombine.low %v1464_v36, %v1089_v43  ;;  %v1423_v46 = vcombine.high %v1464_v36, %v1089_v43  ;;  %v1729_v47 = vunpack.i.h.bf16 %v1727_v44  ;;  %v1728_v48 = vunpack.i.l.bf16 %v1727_v44 }
 0x271   : > { %v910_v51 = vsel %vm268_vm0, %v1728_v48, %v1729_v47  ;;  %v911_v53 = vsel %vm268_vm0, %v1729_v47, %v909_v26  ;;  %1193 = vmatprep.subr.bf16.mxu1 %v1423_v46  ;;  %vm1531_vm0 = vmpackc.low %vm2171_vm7, %vm2181_vm9 }
 0x272   : > { %1194 = vmatpush1.bf16.msra.mxu1 %v1422_v45  ;;  %v940_v27 = vpop.permute.xlu0 %939  ;;  %v914_v17 = vsel %vm2177_vm8, %v910_v51, 0.0  ;;  %v915_v56 = vsel %vm2171_vm7, %v911_v53, 0.0  ;;  %vm1534_vm7 = vmpackc.low %vm2177_vm8, %vm2213_vm13 }
 0x273   : > { %v943_v55 = vrot.slane %v940_v27, 4  ;;  %1527 = vmatprep.subr.msk.bf16.mxu1 %vm1525_vm3, %v1526_v20  ;;  %v1457_v61 = vpack.c.bf16 %v915_v56, %v914_v17 }
 0x275   : > { %v945_v58 = vsel %vm404_vm4, %v943_v55, %v944_v37  ;;  %vm1174_vm4 = vcmask 588800  }
 0x276   : > { %v946_v59 = vsel %vm2443_vm6, %v940_v27, %v945_v58  ;;  %1530 = vmatpush1.bf16.msk.msra.mxu1 %vm1528_vm5, %v1529_v12  ;;  %v956_v60 = vpop.permute.xlu0 %955 }
 0x277   : > { %v961_v2 = vsel %vm442_vm1, %v956_v60, %v1718_v42  ;;  %1533 = vmatprep.subr.msk.bf16.mxu1 %vm1531_vm0, %v1532_v29  ;;  %v1417_v4 = vcombine.high %v1457_v61, %v946_v59  ;;  %v1416_v10 = vcombine.low %v1457_v61, %v946_v59 }
 0x278   : > { %v1535_v57 = vpack.c.bf16 %v988_v52, %v961_v2 }
 0x27a   : > { %1536 = vmatpush1.bf16.msk.msra.mxu1 %vm1534_vm7, %v1535_v57 }
 0x27b   : > { %1199 = vmatprep.subr.bf16.mxu1 %v1417_v4 }
 0x27e   : > { %1200 = vmatpush1.bf16.msra.mxu1 %v1416_v10 }
 0x281   : > { %1427 = vmatmul.mubr.msk.bf16.vlgmr.msra.gmra.mxu1 %vm1174_vm4, %v1119_v21 }
 0x341   : > { %v1219_v62 = vpop.f32.mrf.mxu1 }
 0x342   : > { %v1226_v3 = vmax.f32 %v1219_v62, 0.0 }
 0x343   : > { %v1221_v25 = vpop.f32.mrf.mxu1 }
 0x344   : > { %1228 = vst [vmem:[%s263_s20] sm:$0xff] %v1226_v3  ;;  %v1227_v63 = vmax.f32 %v1221_v25, 0.0 }
 0x345   : > { %v1223_v0 = vpop.f32.mrf.mxu1 }
 0x346   : > { %1229 = vst [vmem:[%s263_s20 + $0x8] sm:$0xff] %v1227_v63 }
 0x347   : > { %v1224_v5 = vpop.f32.mrf.mxu1 }
 0x348   : > { %1828 = shalt.err (!%p1825_p13)
}
 0x349   : > { %s1829_s13 = scalar_lea.hbm %s2361_s14, 256  ;;  %s1833_s30 = scalar_lea.hbm %s2408_s4, 512 }
 0x34a   : > { %p1830_p12 = scmp.ne.s32.totalorder %s2361_s14, %s1829_s13  ;;  %p1834_p10 = scmp.lt.s32.totalorder %s2361_s14, %s2408_s4 }
 0x34b   : > { %p1835_p3 = scmp.lt.s32.totalorder %s1833_s30, %s1829_s13 }
 0x34c   : > { %p1831_p1 = pnand %p1830_p12, %p2444_p7 }
 0x34d   : > { %p1836_p5 = por %p1835_p3, %p1834_p10 }
 0x34e   : > { %p1832_p4 = pneg %p1831_p1 }
 0x350   : > { %p1837_p2 = pnand %p1836_p5, %p1832_p4 }
 0x352   : > { %1840 = shalt.err (!%p1837_p2)
}
 0x353   : > { %1545 = dma.vmem_to_hbm [thread:$0]  (%p2444_p7), %s2363_s28, 256, %s2361_s14, %s1231_s19  }
 0x354 PF: > { %s1257_s8 = sand.u32 1, %s1875_s15   ;;  %p2445_p8 = scmp.ne.s32.totalorder %s2417_s27, 0 }
 0x355   : > { %p2446_p9 = scmp.ge.s32.totalorder %s1887_s18, 2  ;;  %s1258_s0 = scalar_lea.sflag [#allocation8], %s1257_s8 }
 0x357   : > { %p1559_p0 = pnand %p2446_p9, %p2445_p8 }
 0x359   : > { %p1560_p6 = pneg %p1559_p0 }
 0x35b   : > { %1870 = dma.done.wait (%p1560_p6), %s1258_s0, 256  }
 0x35c   : > { %1872 = vsyncadd (%p1560_p6), %s1258_s0, 4294967040  ;;  %p20_p11 = scmp.ge.s32.totalorder %s1954_s21, 4   ;;  %s2447_s15 = smov %s1879_s16 }
 0x35d   : > { %s2448_s16 = smov %s1883_s17  ;;  %s2449_s17 = smov %s1966_s24 }
 0x35e   : > { %s2450_s18 = smov %s1954_s21  ;;  %22 = sbr.rel (!%p20_p11) target bundleno = 9 (0x9), region = 98 }
 0x363   :  { %1263 = vsyncpa [#allocation7], 1 }
 0x364   :  { %1265 = vsyncpa [#allocation7 + $0x1], 1 }
 0x365   :  { %1266 = vsyncpa [#allocation10], 1 }
 0x366   :  { %1268 = vsyncpa [#allocation10 + $0x1], 1 }
 0x367   :  { %1269 = vsyncpa [#allocation8], 1 }
 0x368   :  { %1271 = vsyncpa [#allocation8 + $0x1], 1 }

</bundles_post_ra>
